<compile_context>
chip_gen: v7x
topology: tpu7x:2x2x1
jax: 0.10.0
libtpu: 0.0.40
codegen_flags: <defaults>
</compile_context>

<pallas_src>
import math
import functools

import jax
import jax.numpy as jnp
from jax.experimental import pallas as pl
from jax.experimental.pallas import tpu as pltpu


_HALF_PI = math.pi / 2.0
# Degree-9 odd Taylor polynomial for sin(y) on [-pi/2, pi/2]; max abs error ~3.5e-6.
_S3 = -1.0 / 6.0
_S5 = 1.0 / 120.0
_S7 = -1.0 / 5040.0
_S9 = 1.0 / 362880.0


def _rbf_kernel(feat_ref, sel_ref, params_ref, o_ref, *, c1, c0m, cutoff_lower):
    # feat_ref:   (T, F)  bf16 — 3-way bf16 split of each packed distance
    # sel_ref:    (F, L)  bf16 — one-hot selection, column l picks distance group l // k
    # params_ref: (2, L)  f32  — row 0: means (tiled), row 1: coeffs (tiled)
    # o_ref:      (T, L)       — expanded output tile (lane-dense when 128 % K == 0)

    # MXU: reconstruct the per-lane distance map d_l[t, l] = d[t*pack + l//k].
    # Exact: lhs columns are bf16 components summing to the f32 distance and the
    # rhs is a {0,1} one-hot, so products and the f32 accumulation are exact.
    d_l = jnp.dot(feat_ref[...], sel_ref[...], preferred_element_type=jnp.float32)

    mean = params_ref[0:1, :]          # (1, L)
    coeff = params_ref[1:2, :]         # (1, L)

    # Gaussian basis (VPU + EUP exp).
    diff = d_l - mean
    gauss = jnp.exp(coeff * (diff * diff))

    # Cosine-cutoff envelope 0.5*(1 + cos(pi*(d - lower)/span)):
    # evaluate as 0.5*(1 - sin(y)), y = d*c1 + c0 - pi/2 clamped to [-pi/2, pi/2].
    # The clamp gives 0 at/above the upper cutoff; one compare handles d < lower.
    y = jnp.clip(d_l * c1 + c0m, -_HALF_PI, _HALF_PI)
    y2 = y * y
    s = y * (1.0 + y2 * (_S3 + y2 * (_S5 + y2 * (_S7 + y2 * _S9))))
    env = jnp.maximum(0.5 - 0.5 * s, 0.0)
    env = jnp.where(d_l >= cutoff_lower, env, 0.0)

    o_ref[...] = (gauss * env).astype(o_ref.dtype)


def radial_basis_forward(distances, means, coeffs, *, cutoff_lower, cutoff_upper,
                         tile_rows=4096, out_dtype=jnp.float32):
    """distances: [N] -> expanded: [N, K] (Gaussian RBF * cosine cutoff)."""
    cutoff_lower = float(cutoff_lower)
    cutoff_upper = float(cutoff_upper)

    # check_cutoff() semantics from the base class, plus a zero-span guard.
    if cutoff_upper < cutoff_lower:
        raise ValueError("Upper cutoff {} is less than lower cutoff {}".format(
            cutoff_upper, cutoff_lower))
    if cutoff_upper == cutoff_lower:
        raise ValueError(
            "Upper cutoff equals lower cutoff; cosine-cutoff span would be zero")

    n = distances.shape[0]
    k = means.shape[0]

    # Lane packing: present [N, K] (row-major) as [N/pack, pack*K] so the output
    # tile's lane dim is a multiple of 128 -> unmasked stores.
    if k % 128 == 0:
        pack = 1
    elif 128 % k == 0:
        pack = 128 // k
    else:
        pack = 1  # TODO(synk): masked-store path when K does not divide 128
    L = pack * k

    # Row tiling: multiples of 16 (bf16 sublane tile), balanced across >= 2
    # grid steps when possible so both v7x TensorCores get work.
    ROW = 16
    rows = pl.cdiv(n, pack)
    rows_al = pl.cdiv(rows, ROW) * ROW
    tr = max(ROW, (min(int(tile_rows), rows_al) // ROW) * ROW)
    steps = pl.cdiv(rows_al, tr)
    if steps == 1 and rows_al >= 2 * ROW:
        steps = 2
    tr = max(ROW, pl.cdiv(pl.cdiv(rows, steps), ROW) * ROW)
    rows_pad = pl.cdiv(rows, tr) * tr
    n_pad = rows_pad * pack

    d = distances.astype(jnp.float32)
    if n_pad != n:
        # Padded distances use an in-range constant (finite output); padded
        # rows are sliced off below.
        d = jnp.concatenate(
            [d, jnp.full((n_pad - n,), cutoff_lower, jnp.float32)])

    # Exact 3-way bf16 split: h1 + h2 + h3 == d to within one f32 ulp, and each
    # component is (bf16-)exact, so the one-hot MXU matmul reconstructs d exactly.
    h1 = d.astype(jnp.bfloat16)
    r1 = d - h1.astype(jnp.float32)
    h2 = r1.astype(jnp.bfloat16)
    h3 = (r1 - h2.astype(jnp.float32)).astype(jnp.bfloat16)

    F = max(8, pl.cdiv(3 * pack, 8) * 8)
    feat = jnp.stack([h1, h2, h3], axis=-1).reshape(rows_pad, 3 * pack)
    if F != 3 * pack:
        feat = jnp.pad(feat, ((0, 0), (0, F - 3 * pack)))

    # One-hot selection: feature column 3p+j feeds every lane of group p (= l // k).
    col = jnp.arange(F, dtype=jnp.int32)
    lane = jnp.arange(L, dtype=jnp.int32)
    sel = ((col[:, None] // 3) == (lane[None, :] // k)) & (col[:, None] < 3 * pack)
    sel = sel.astype(jnp.bfloat16)                                   # (F, L)

    mean_row = jnp.tile(means.astype(jnp.float32).reshape(1, k), (1, pack))
    coeff_row = jnp.tile(coeffs.astype(jnp.float32).reshape(1, k), (1, pack))
    params = jnp.concatenate([mean_row, coeff_row], axis=0)          # (2, L)

    span = cutoff_upper - cutoff_lower
    c1 = math.pi / span
    c0m = -math.pi * cutoff_lower / span - math.pi / 2.0  # arg - pi/2, pre-folded

    kernel = functools.partial(
        _rbf_kernel, c1=c1, c0m=c0m, cutoff_lower=cutoff_lower)

    out_itemsize = jnp.dtype(out_dtype).itemsize
    cost = pl.CostEstimate(
        flops=int(rows_pad) * int(L) * (2 * int(F) + 25),
        transcendentals=int(rows_pad) * int(L),
        bytes_accessed=int(rows_pad * F * 2 + F * L * 2 + 2 * L * 4
                           + rows_pad * L * out_itemsize),
    )

    out = pl.pallas_call(
        kernel,
        out_shape=jax.ShapeDtypeStruct((rows_pad, L), out_dtype),
        grid_spec=pltpu.PrefetchScalarGridSpec(
            num_scalar_prefetch=0,
            grid=(rows_pad // tr,),
            in_specs=[
                pl.BlockSpec((tr, F), lambda i: (i, 0)),   # distance features
                pl.BlockSpec((F, L), lambda i: (0, 0)),    # one-hot selection (resident)
                pl.BlockSpec((2, L), lambda i: (0, 0)),    # means / coeffs (resident)
            ],
            out_specs=pl.BlockSpec((tr, L), lambda i: (i, 0)),
        ),
        compiler_params=pltpu.CompilerParams(
            dimension_semantics=("parallel",),
            vmem_limit_bytes=48 * 1024 * 1024,
        ),
        cost_estimate=cost,
    )(feat, sel, params)

    # [rows_pad, pack*K] row-major is bit-identical to [rows_pad*pack, K].
    out = out.reshape(rows_pad * pack, k)
    return out[:n]


def reference_forward(distances, means, coeffs, cutoff_lower, cutoff_upper):
    d = distances[:, None]
    gauss = jnp.exp(coeffs[None, :] * (d - means[None, :]) ** 2)
    span = cutoff_upper - cutoff_lower
    env = 0.5 * (jnp.cos(math.pi * (d - cutoff_lower) / span) + 1.0)
    env = jnp.where((d >= cutoff_lower) & (d <= cutoff_upper), env, 0.0)
    return gauss * env


if __name__ == "__main__":
    # Deterministic parameter init, matching a typical radial-basis __init__:
    # num_rbf gaussian centers evenly spaced in [cutoff_lower, cutoff_upper],
    # shared width -> per-basis coefficient -0.5/width^2.
    cutoff_lower = 0.0
    cutoff_upper = 5.0
    num_rbf = 64          # basis axis; packed 2-per-row into 128 lanes
    n_dist = 256          # number of distances (e.g. edges in a graph)

    means = jnp.linspace(cutoff_lower, cutoff_upper, num_rbf, dtype=jnp.float32)
    width = (cutoff_upper - cutoff_lower) / num_rbf
    coeffs = jnp.full((num_rbf,), -0.5 / (width * width), dtype=jnp.float32)

    key = jax.random.PRNGKey(0)
    distances = jax.random.uniform(
        key, (n_dist,), dtype=jnp.float32,
        minval=cutoff_lower, maxval=cutoff_upper + 0.5)  # a few past the cutoff

    out = radial_basis_forward(
        distances, means, coeffs,
        cutoff_lower=cutoff_lower, cutoff_upper=cutoff_upper)
    out = jax.block_until_ready(out)

    ref = reference_forward(distances, means, coeffs, cutoff_lower, cutoff_upper)
    assert out.shape == (n_dist, num_rbf)
    assert jnp.allclose(out, ref, atol=1e-5, rtol=1e-5)

    # Padding / odd-N path (N not a multiple of pack or the tile).
    n_odd = 251
    d_odd = distances[:n_odd]
    out_odd = jax.block_until_ready(radial_basis_forward(
        d_odd, means, coeffs,
        cutoff_lower=cutoff_lower, cutoff_upper=cutoff_upper))
    ref_odd = reference_forward(d_odd, means, coeffs, cutoff_lower, cutoff_upper)
    assert out_odd.shape == (n_odd, num_rbf)
    assert jnp.allclose(out_odd, ref_odd, atol=1e-5, rtol=1e-5)

    # bf16 output path (halves writeback bytes on all generations).
    out_bf16 = jax.block_until_ready(radial_basis_forward(
        distances, means, coeffs,
        cutoff_lower=cutoff_lower, cutoff_upper=cutoff_upper,
        out_dtype=jnp.bfloat16))
    assert out_bf16.dtype == jnp.bfloat16
    assert jnp.allclose(out_bf16.astype(jnp.float32), ref, atol=1e-2, rtol=1e-2)

    # pack=1 path (K a multiple of 128) including distances below the lower cutoff,
    # the same regime .plot() exercises.
    k2 = 128
    means2 = jnp.linspace(cutoff_lower, cutoff_upper, k2, dtype=jnp.float32)
    width2 = (cutoff_upper - cutoff_lower) / k2
    coeffs2 = jnp.full((k2,), -0.5 / (width2 * width2), dtype=jnp.float32)
    d2 = jax.random.uniform(
        jax.random.PRNGKey(1), (100,), dtype=jnp.float32,
        minval=cutoff_lower - 0.5, maxval=cutoff_upper + 0.5)
    out2 = jax.block_until_ready(radial_basis_forward(
        d2, means2, coeffs2,
        cutoff_lower=cutoff_lower, cutoff_upper=cutoff_upper))
    ref2 = reference_forward(d2, means2, coeffs2, cutoff_lower, cutoff_upper)
    assert out2.shape == (100, k2)
    assert jnp.allclose(out2, ref2, atol=1e-5, rtol=1e-5)

    print("KERNEL_OK")
</pallas_src>

<mosaic_0001>
module attributes {stable_mosaic.version = 11 : i64} {
  func.func @_rbf_kernel(%arg0: i32, %arg1: memref<64x8xbf16, #tpu.memory_space<vmem>>, %arg2: memref<8x128xbf16, #tpu.memory_space<vmem>>, %arg3: memref<2x128xf32, #tpu.memory_space<vmem>>, %arg4: memref<64x128xf32, #tpu.memory_space<vmem>>) attributes {dimension_semantics = [#tpu.dimension_semantics<parallel>], iteration_bounds = array<i64: 2>, scalar_prefetch = 0 : i64, scratch_operands = 0 : i64, tpu.core_type = #tpu.core_type<tc>, window_params = [{transform_indices = @transform_0, window_bounds = array<i64: 64, 8>}, {pipeline_mode = #tpu.pipeline_mode<synchronous>, transform_indices = @transform_1, window_bounds = array<i64: 8, 128>}, {pipeline_mode = #tpu.pipeline_mode<synchronous>, transform_indices = @transform_2, window_bounds = array<i64: 2, 128>}, {transform_indices = @transform_3, window_bounds = array<i64: 64, 128>}]} {
    %c0 = arith.constant 0 : index
    %c0_0 = arith.constant 0 : index
    %0 = vector.load %arg1[%c0, %c0_0] : memref<64x8xbf16, #tpu.memory_space<vmem>>, vector<64x8xbf16>
    %c0_1 = arith.constant 0 : index
    %c0_2 = arith.constant 0 : index
    %1 = vector.load %arg2[%c0_1, %c0_2] : memref<8x128xbf16, #tpu.memory_space<vmem>>, vector<8x128xbf16>
    %cst = arith.constant dense<0.000000e+00> : vector<64x128xf32>
    %2 = tpu.matmul %0, %1, %cst {dimension_numbers = #tpu.dot_dimension_numbers<[1], [0], [0], [1], [0, 0, 1, 1], [], []>} : vector<64x8xbf16>, vector<8x128xbf16>, vector<64x128xf32> -> vector<64x128xf32>
    %c0_3 = arith.constant 0 : index
    %c0_4 = arith.constant 0 : index
    %3 = vector.load %arg3[%c0_3, %c0_4] : memref<2x128xf32, #tpu.memory_space<vmem>>, vector<1x128xf32>
    %c1 = arith.constant 1 : index
    %c0_5 = arith.constant 0 : index
    %4 = vector.load %arg3[%c1, %c0_5] : memref<2x128xf32, #tpu.memory_space<vmem>>, vector<1x128xf32>
    %5 = vector.broadcast %3 : vector<1x128xf32> to vector<64x128xf32>
    %6 = arith.subf %2, %5 : vector<64x128xf32>
    %7 = arith.mulf %6, %6 : vector<64x128xf32>
    %8 = vector.broadcast %4 : vector<1x128xf32> to vector<64x128xf32>
    %9 = arith.mulf %8, %7 : vector<64x128xf32>
    %10 = math.exp %9 : vector<64x128xf32>
    %cst_6 = arith.constant 0.628318548 : f32
    %11 = vector.broadcast %cst_6 : f32 to vector<64x128xf32>
    %12 = arith.mulf %2, %11 : vector<64x128xf32>
    %cst_7 = arith.constant -1.57079637 : f32
    %13 = vector.broadcast %cst_7 : f32 to vector<64x128xf32>
    %14 = arith.addf %12, %13 : vector<64x128xf32>
    %cst_8 = arith.constant -1.57079637 : f32
    %cst_9 = arith.constant 1.57079637 : f32
    %15 = vector.broadcast %cst_8 : f32 to vector<64x128xf32>
    %16 = arith.maximumf %15, %14 : vector<64x128xf32>
    %17 = vector.broadcast %cst_9 : f32 to vector<64x128xf32>
    %18 = arith.minimumf %17, %16 : vector<64x128xf32>
    %19 = arith.mulf %18, %18 : vector<64x128xf32>
    %cst_10 = arith.constant 2.75573188E-6 : f32
    %20 = vector.broadcast %cst_10 : f32 to vector<64x128xf32>
    %21 = arith.mulf %19, %20 : vector<64x128xf32>
    %cst_11 = arith.constant -1.98412701E-4 : f32
    %22 = vector.broadcast %cst_11 : f32 to vector<64x128xf32>
    %23 = arith.addf %22, %21 : vector<64x128xf32>
    %24 = arith.mulf %19, %23 : vector<64x128xf32>
    %cst_12 = arith.constant 0.00833333377 : f32
    %25 = vector.broadcast %cst_12 : f32 to vector<64x128xf32>
    %26 = arith.addf %25, %24 : vector<64x128xf32>
    %27 = arith.mulf %19, %26 : vector<64x128xf32>
    %cst_13 = arith.constant -0.166666672 : f32
    %28 = vector.broadcast %cst_13 : f32 to vector<64x128xf32>
    %29 = arith.addf %28, %27 : vector<64x128xf32>
    %30 = arith.mulf %19, %29 : vector<64x128xf32>
    %cst_14 = arith.constant 1.000000e+00 : f32
    %31 = vector.broadcast %cst_14 : f32 to vector<64x128xf32>
    %32 = arith.addf %31, %30 : vector<64x128xf32>
    %33 = arith.mulf %18, %32 : vector<64x128xf32>
    %cst_15 = arith.constant 5.000000e-01 : f32
    %34 = vector.broadcast %cst_15 : f32 to vector<64x128xf32>
    %35 = arith.mulf %34, %33 : vector<64x128xf32>
    %cst_16 = arith.constant 5.000000e-01 : f32
    %36 = vector.broadcast %cst_16 : f32 to vector<64x128xf32>
    %37 = arith.subf %36, %35 : vector<64x128xf32>
    %cst_17 = arith.constant 0.000000e+00 : f32
    %38 = vector.broadcast %cst_17 : f32 to vector<64x128xf32>
    %39 = arith.maximumf %37, %38 : vector<64x128xf32>
    %cst_18 = arith.constant 0.000000e+00 : f32
    %40 = vector.broadcast %cst_18 : f32 to vector<64x128xf32>
    %41 = arith.cmpf oge, %2, %40 : vector<64x128xf32>
    %cst_19 = arith.constant 0.000000e+00 : f32
    %42 = vector.broadcast %cst_19 : f32 to vector<64x128xf32>
    %43 = arith.select %41, %39, %42 : vector<64x128xi1>, vector<64x128xf32>
    %44 = arith.mulf %10, %43 : vector<64x128xf32>
    %c0_20 = arith.constant 0 : index
    %c0_21 = arith.constant 0 : index
    %45 = vector.load %arg4[%c0_20, %c0_21] : memref<64x128xf32, #tpu.memory_space<vmem>>, vector<64x128xf32>
    tpu.vector_store %arg4[%c0_20, %c0_21], %44 {strides = array<i32>} : memref<64x128xf32, #tpu.memory_space<vmem>>, vector<64x128xf32>,
    return
  }
  func.func @transform_0(%arg0: i32) -> (i32, i32) {
    %c0_i32 = arith.constant 0 : i32
    %c0_i32_0 = arith.constant 0 : i32
    return %arg0, %c0_i32 : i32, i32
  }
  func.func @transform_1(%arg0: i32) -> (i32, i32) {
    %c0_i32 = arith.constant 0 : i32
    %c0_i32_0 = arith.constant 0 : i32
    %c0_i32_1 = arith.constant 0 : i32
    return %c0_i32, %c0_i32_0 : i32, i32
  }
  func.func @transform_2(%arg0: i32) -> (i32, i32) {
    %c0_i32 = arith.constant 0 : i32
    %c0_i32_0 = arith.constant 0 : i32
    %c0_i32_1 = arith.constant 0 : i32
    return %c0_i32, %c0_i32_0 : i32, i32
  }
  func.func @transform_3(%arg0: i32) -> (i32, i32) {
    %c0_i32 = arith.constant 0 : i32
    %c0_i32_0 = arith.constant 0 : i32
    return %arg0, %c0_i32 : i32, i32
  }
}

</mosaic_0001>

<bundles_post_ra>
// kernel: tpu_custom_call.1
= control target key start
LH: loop header
LB: loop body
LE: loop exit
PB: predicated region body
PF: predicated region fallthrough
CT: control target
= control target key end

     0   :  { %8 = vsyncpa [#allocation3], 0  ;;  %s1015_s0 = inlined_call_operand.vmem [shape: bf16[128,8], index: 0, kind: input, shape index: {}]   ;;  %s1016_s1 = inlined_call_operand.vmem [shape: bf16[8,128], index: 1, kind: input, shape index: {}]   ;;  %s1017_s2 = inlined_call_operand.vmem [shape: f32[2,128], index: 2, kind: input, shape index: {}]   ;;  %s1018_s3 = inlined_call_operand.hbm [shape: f32[128,128], index: 3, kind: output, shape index: {}]  }
   0x1   :  { %10 = vsyncpa [#allocation3 + $0x1], 0  ;;  %s776_s12 = smov 0   ;;  %s778_s13 = smov 0  }
   0x2   :  { %s780_s14 = smov 0   ;;  %s782_s15 = smov 0  }
   0x3 LB: > { %s797_s16 = sadd.s32 4294967295, %s751_s15   ;;  %s578_s17 = sadd.s32 4294967294, %s751_s15   ;;  %s751_s15 = sphi %s782_s15, %s1024_s15   ;;  %s747_s14 = sphi %s780_s14, %s1023_s14   ;;  %s743_s13 = sphi %s778_s13, %s1022_s13   ;;  %s739_s12 = sphi %s776_s12, %s1021_s12  }
   0x4   : > { %s801_s18 = sadd.s32 1, %s751_s15   ;;  %s91_s19 = sadd.s32 1, %s747_s14 }
   0x5   : > { %s88_s20 = ssub.s32 %s751_s15, %s801_s18  ;;  %p101_p0 = scmp.ne.s32.totalorder %s747_s14, %s743_s13 }
   0x6   : > { %p89_p1 = scmp.eq.s32.totalorder %s88_s20, 0  ;;  %p102_p2 = scmp.eq.s32.totalorder %s797_s16, 1 }
   0x7   : > { %p107_p3 = scmp.ne.s32.totalorder %s743_s13, %s739_s12  ;;  %p108_p4 = scmp.eq.s32.totalorder %s578_s17, 1 }
   0x8   : > { %s812_s21 = scalar_select %p89_p1, %s747_s14, %s91_s19  }
   0x9   : > { %p814_p5 = por %p102_p2, %p101_p0  ;;  %p818_p6 = por %p108_p4, %p107_p3 }
   0xa   : > { %p581_p7 = scmp.ge.s32.totalorder %s751_s15, 1  ;;  %p141_p8 = scmp.lt.s32.totalorder %s751_s15, 3 }
   0xc   : > { %p142_p9 = pnand %p581_p7, %p141_p8 }
   0xd   : > { %v181_v0 = vld [vmem:[%s1016_s1] sm:$0xf] (!%p142_p9)  ;;  %vm215_vm0 = vcmask (!%p142_p9), 1043456   ;;  %s583_s26 = sshll.u32 (!%p142_p9), %s797_s16, 3  ;;  %vm202_vm1 = vcmask (!%p142_p9), 64512   ;;  %s162_s8 = sand.u32 (!%p142_p9), 1, %s743_s13  }
   0xe   : > { %145 = sbr.rel (%p142_p9) target bundleno = 322 (0x142), region = 32  ;;  %626 = vmatprep.subr.msk.bf16.mxu0 (!%p142_p9), %vm215_vm0, %v181_v0  ;;  %627 = vmatprep.subr.msk.bf16.mxu1 (!%p142_p9), %vm215_vm0, %v181_v0  ;;  %v217_v1 = vsel (!%p142_p9), %vm215_vm0, %v181_v0, 0  ;;  %p166_p10 = scmp.lt.s32.totalorder (!%p142_p9), %s583_s26, 15  ;;  %v834_v6 = vld [vmem:[%s1017_s2] ss:$0 sm:$0xff] (!%p142_p9) }
   0xf   : > { %615 = vmatpush3.bf16.msra.mxu0 (!%p142_p9), %v217_v1  ;;  %625 = vmatpush3.bf16.msra.mxu1 (!%p142_p9), %v217_v1  ;;  %v848_v12 = vld [vmem:[%s1017_s2 + $0x1] ss:$0 sm:$0xff] (!%p142_p9)  ;;  %s582_s9 = sshll.u32 (!%p142_p9), %s162_s8, 6  ;;  %s608_s11 = sshll.u32 (!%p142_p9), %s797_s16, 10 }
  0x10   : > { %s940_s10 = scalar_lea.vmem (!%p142_p9), [#allocation2], %s582_s9  ;;  %s967_s24 = scalar_lea.hbm (!%p142_p9), %s1018_s3, %s608_s11 }
  0x11   : > { %s516_s17 = sshll.u32 (!%p142_p9), %s940_s10, 4  ;;  %s974_s16 = scalar_lea.sflag (!%p142_p9), [#allocation3], %s162_s8  ;;  %s969_s17 = int_to_ptr.vmem [resolvable:$true] %s516_s17 }
  0x12   : > { %s689_s25 = scalar_lea.vmem (!%p142_p9), %s969_s17, 1024 }
  0x13   : > { %p690_p11 = scmp.ne.s32.totalorder (!%p142_p9), %s969_s17, %s689_s25 }
  0x15   : > { %s1026_s26 = smov (!%p166_p10, %s583_s26), 15  ;;  %p691_p12 = pnand %p690_p11, %p814_p5 }
  0x16   : > { %s584_s27 = sshll.u32 %s1026_s26, 2  ;;  %s753_s26 = smov [#allocation2]  }
  0x17   : > { %s169_s30 = scalar_lea.vmem %s1015_s0, %s584_s27  ;;  %p692_p13 = pneg %p691_p12 }
  0x18   : > { %v669_v2 = vld [vmem:[%s169_s30] sm:$0xff]   ;;  %v670_v3 = vld [vmem:[%s169_s30 + $0x10] sm:$0xff]   ;;  %v671_v4 = vld [vmem:[%s169_s30 + $0x8] sm:$0xff]   ;;  %s693_s27 = sshll.u32 %s753_s26, 4  ;;  %s694_s27 = int_to_ptr.vmem [resolvable:$false] %s693_s27 }
  0x19   : > { %616 = vmatprep.mubr.msk.bf16.mxu0 %vm202_vm1, %v669_v2  ;;  %620 = vmatprep.mubr.msk.bf16.mxu1 %vm202_vm1, %v670_v3  ;;  %v672_v5 = vld [vmem:[%s169_s30 + $0x18] sm:$0xff]   ;;  %s695_s28 = scalar_lea.vmem %s694_s27, 2048  ;;  %p696_p0 = scmp.lt.s32.totalorder %s969_s17, %s694_s27 }
  0x1a   : > { %617 = vmatmul.mubr.msk.bf16.vlgmr.msra.gmra.mrb[0].mxu0 %vm202_vm1, %v671_v4  ;;  %621 = vmatmul.mubr.msk.bf16.vlgmr.msra.gmra.mrb[0].mxu1 %vm202_vm1, %v672_v5  ;;  %p697_p1 = scmp.lt.s32.totalorder %s695_s28, %s689_s25 }
  0x1c   : > { %p698_p2 = por %p697_p1, %p696_p0 }
  0x1e   : > { %p699_p3 = pnand %p698_p2, %p692_p13 }
  0xed   : > { %v836_v7 = vpop.f32.mrb[0].mxu0  ;;  %v841_v10 = vpop.f32.mrb[0].mxu1 }
  0xee   : > { %v292_v8 = vsub.f32 %v836_v7, %v834_v6  ;;  %v336_v9 = vmul.f32 0.62831855, %v836_v7  ;;  %v843_v11 = vpop.f32.mrb[1].mxu0  ;;  %v296_v13 = vsub.f32 %v841_v10, %v834_v6  ;;  %v340_v14 = vmul.f32 0.62831855, %v841_v10  ;;  %v855_v16 = vpop.f32.mrb[1].mxu1 }
  0xef   : > { %v290_v15 = vsub.f32 %v843_v11, %v834_v6  ;;  %v857_v17 = vpop.f32.mrb[2].mxu0  ;;  %v334_v20 = vmul.f32 0.62831855, %v843_v11  ;;  %v860_v21 = vpop.f32.mrb[2].mxu1  ;;  %v294_v29 = vsub.f32 %v855_v16, %v834_v6  ;;  %v338_v30 = vmul.f32 0.62831855, %v855_v16 }
  0xf0   : > { %v300_v18 = vmul.f32 %v292_v8, %v292_v8  ;;  %v344_v19 = vadd.f32 -1.5707964, %v336_v9  ;;  %v304_v22 = vmul.f32 %v296_v13, %v296_v13  ;;  %v348_v23 = vadd.f32 -1.5707964, %v340_v14  ;;  %v862_v25 = vpop.f32.mrb[3].mxu0  ;;  %v864_v26 = vpop.f32.mrb[3].mxu1 }
  0xf1   : > { %v298_v24 = vmul.f32 %v290_v15, %v290_v15  ;;  %v342_v28 = vadd.f32 -1.5707964, %v334_v20  ;;  %v346_v36 = vadd.f32 -1.5707964, %v338_v30  ;;  %v302_v41 = vmul.f32 %v294_v29, %v294_v29 }
  0xf2   : > { %v866_v27 = vclamps-f32 %v344_v19, 1.5707964  ;;  %v312_v31 = vmul.f32 %v848_v12, %v300_v18  ;;  %v872_v32 = vclamps-f32 %v348_v23, 1.5707964  ;;  %v316_v34 = vmul.f32 %v848_v12, %v304_v22 }
  0xf3   : > { %v877_v35 = vclamps-f32 %v342_v28, 1.5707964  ;;  %v310_v38 = vmul.f32 %v848_v12, %v298_v24  ;;  %v884_v42 = vclamps-f32 %v346_v36, 1.5707964  ;;  %v293_v51 = vsub.f32 %v857_v17, %v834_v6 }
  0xf4   : > { %v368_v33 = vmul.f32 %v866_v27, %v866_v27  ;;  %v372_v37 = vmul.f32 %v872_v32, %v872_v32  ;;  %v322_v43 = vmul.f32 1.442695, %v312_v31  ;;  %v330_v46 = vmul.f32 1.442695, %v316_v34 }
  0xf5   : > { %v366_v40 = vmul.f32 %v877_v35, %v877_v35  ;;  %v370_v48 = vmul.f32 %v884_v42, %v884_v42  ;;  %v318_v50 = vmul.f32 1.442695, %v310_v38  ;;  %v337_v52 = vmul.f32 0.62831855, %v857_v17 }
  0xf6   : > { %v376_v39 = vmul.f32 2.7557319e-06, %v368_v33  ;;  %v380_v44 = vmul.f32 2.7557319e-06, %v372_v37  ;;  %v314_v55 = vmul.f32 %v848_v12, %v302_v41  ;;  %673 = vpow2.f32 %v322_v43 }
  0xf7   : > { %v374_v47 = vmul.f32 2.7557319e-06, %v366_v40  ;;  %v378_v56 = vmul.f32 2.7557319e-06, %v370_v48  ;;  %v301_v58 = vmul.f32 %v293_v51, %v293_v51  ;;  %v345_v59 = vadd.f32 -1.5707964, %v337_v52 }
  0xf8   : > { %v384_v45 = vadd.f32 -0.0001984127, %v376_v39  ;;  %v388_v49 = vadd.f32 -0.0001984127, %v380_v44  ;;  %v341_v63 = vmul.f32 0.62831855, %v860_v21  ;;  %675 = vpow2.f32 %v330_v46 }
  0xf9   : > { %v382_v54 = vadd.f32 -0.0001984127, %v374_v47  ;;  %v386_v62 = vadd.f32 -0.0001984127, %v378_v56  ;;  %v893_v1 = vclamps-f32 %v345_v59, 1.5707964  ;;  %v297_v2 = vsub.f32 %v860_v21, %v834_v6 }
  0xfa   : > { %v392_v53 = vmul.f32 %v384_v45, %v368_v33  ;;  %v396_v57 = vmul.f32 %v388_v49, %v372_v37  ;;  %v349_v8 = vadd.f32 -1.5707964, %v341_v63  ;;  %v326_v13 = vmul.f32 1.442695, %v314_v55 }
  0xfb   : > { %v390_v61 = vmul.f32 %v382_v54, %v366_v40  ;;  %v394_v5 = vmul.f32 %v386_v62, %v370_v48  ;;  %v313_v14 = vmul.f32 %v848_v12, %v301_v58  ;;  %v900_v15 = vmul.f32 %v893_v1, %v893_v1 }
  0xfc   : > { %v400_v60 = vadd.f32 0.008333334, %v392_v53  ;;  %v404_v0 = vadd.f32 0.008333334, %v396_v57  ;;  %v902_v22 = vclamps-f32 %v349_v8, 1.5707964  ;;  %677 = vpow2.f32 %v318_v50 }
  0xfd   : > { %v398_v4 = vadd.f32 0.008333334, %v390_v61  ;;  %v402_v20 = vadd.f32 0.008333334, %v394_v5  ;;  %v377_v24 = vmul.f32 2.7557319e-06, %v900_v15  ;;  %v305_v28 = vmul.f32 %v297_v2, %v297_v2 }
  0xfe   : > { %v408_v3 = vmul.f32 %v400_v60, %v368_v33  ;;  %v412_v9 = vmul.f32 %v404_v0, %v372_v37  ;;  %v907_v34 = vmul.f32 %v902_v22, %v902_v22  ;;  %679 = vpow2.f32 %v326_v13 }
  0xff   : > { %v406_v19 = vmul.f32 %v398_v4, %v366_v40  ;;  %v410_v31 = vmul.f32 %v402_v20, %v370_v48  ;;  %v324_v38 = vmul.f32 1.442695, %v313_v14  ;;  %v385_v39 = vadd.f32 -0.0001984127, %v377_v24 }
 0x100   : > { %v416_v18 = vadd.f32 -0.16666667, %v408_v3  ;;  %v420_v23 = vadd.f32 -0.16666667, %v412_v9  ;;  %v381_v45 = vmul.f32 2.7557319e-06, %v907_v34  ;;  %v674_v46 = vpop.eup %673  ;;  %v317_v49 = vmul.f32 %v848_v12, %v305_v28 }
 0x101   : > { %v414_v30 = vadd.f32 -0.16666667, %v406_v19  ;;  %v418_v44 = vadd.f32 -0.16666667, %v410_v31  ;;  %vm472_vm2 = vcmp.ge.f32.partialorder %v836_v7, 0.0  ;;  %v393_v47 = vmul.f32 %v385_v39, %v900_v15 }
 0x102   : > { %v424_v29 = vmul.f32 %v416_v18, %v368_v33  ;;  %v428_v36 = vmul.f32 %v420_v23, %v372_v37  ;;  %v335_v50 = vmul.f32 0.62831855, %v862_v25  ;;  %vm476_vm3 = vcmp.ge.f32.partialorder %v841_v10, 0.0  ;;  %v676_v53 = vpop.eup %675 }
 0x103   : > { %v422_v43 = vmul.f32 %v414_v30, %v366_v40  ;;  %v426_v40 = vmul.f32 %v418_v44, %v370_v48  ;;  %v389_v52 = vadd.f32 -0.0001984127, %v381_v45  ;;  %vm470_vm4 = vcmp.ge.f32.partialorder %v843_v11, 0.0 }
 0x104   : > { %v432_v41 = vadd.f32 1.0, %v424_v29  ;;  %v436_v33 = vadd.f32 1.0, %v428_v36  ;;  %681 = vpow2.f32 %v324_v38  ;;  %v401_v55 = vadd.f32 0.008333334, %v393_v47 }
 0x105   : > { %v430_v51 = vadd.f32 1.0, %v422_v43  ;;  %v343_v56 = vadd.f32 -1.5707964, %v335_v50  ;;  %v434_v59 = vadd.f32 1.0, %v426_v40  ;;  %v291_v61 = vsub.f32 %v862_v25, %v834_v6 }
 0x106   : > { %v440_v37 = vmul.f32 %v866_v27, %v432_v41  ;;  %v444_v54 = vmul.f32 %v872_v32, %v436_v33  ;;  %v397_v27 = vmul.f32 %v389_v52, %v907_v34  ;;  %v409_v48 = vmul.f32 %v401_v55, %v900_v15  ;;  %v678_v3 = vpop.eup %677 }
 0x107   : > { %v438_v58 = vmul.f32 %v877_v35, %v430_v51  ;;  %v924_v32 = vclamps-f32 %v343_v56, 1.5707964  ;;  %v442_v0 = vmul.f32 %v884_v42, %v434_v59  ;;  %v332_v5 = vmul.f32 1.442695, %v317_v49 }
 0x108   : > { %v448_v57 = vmul.f32 0.5, %v440_v37  ;;  %v452_v60 = vmul.f32 0.5, %v444_v54  ;;  %v405_v2 = vadd.f32 0.008333334, %v397_v27  ;;  %v417_v4 = vadd.f32 -0.16666667, %v409_v48  ;;  %v680_v19 = vpop.eup %679 }
 0x109   : > { %v446_v63 = vmul.f32 0.5, %v438_v58  ;;  %v367_v8 = vmul.f32 %v924_v32, %v924_v32  ;;  %v450_v14 = vmul.f32 0.5, %v442_v0  ;;  %v299_v42 = vmul.f32 %v291_v61, %v291_v61 }
 0x10a   : > { %v456_v62 = vsub.f32 0.5, %v448_v57  ;;  %v460_v35 = vsub.f32 0.5, %v452_v60  ;;  %v413_v18 = vmul.f32 %v405_v2, %v907_v34  ;;  %v425_v23 = vmul.f32 %v417_v4, %v900_v15 }
 0x10b   : > { %v454_v13 = vsub.f32 0.5, %v446_v63  ;;  %v375_v24 = vmul.f32 2.7557319e-06, %v367_v8  ;;  %v458_v30 = vsub.f32 0.5, %v450_v14  ;;  %vm474_vm5 = vcmp.ge.f32.partialorder %v855_v16, 0.0 }
 0x10c   : > { %v464_v9 = vmax.f32 %v456_v62, 0.0  ;;  %v468_v20 = vmax.f32 %v460_v35, 0.0  ;;  %v421_v31 = vadd.f32 -0.16666667, %v413_v18  ;;  %v433_v39 = vadd.f32 1.0, %v425_v23 }
 0x10d   : > { %v462_v29 = vmax.f32 %v454_v13, 0.0  ;;  %v383_v41 = vadd.f32 -0.0001984127, %v375_v24  ;;  %v466_v45 = vmax.f32 %v458_v30, 0.0  ;;  %683 = vpow2.f32 %v332_v5 }
 0x10e   : > { %v480_v28 = vsel %vm472_vm2, %v464_v9, 0.0  ;;  %v484_v38 = vsel %vm476_vm3, %v468_v20, 0.0  ;;  %v429_v15 = vmul.f32 %v421_v31, %v907_v34  ;;  %v682_v33 = vpop.eup %681  ;;  %v441_v10 = vmul.f32 %v893_v1, %v433_v39 }
 0x10f   : > { %v488_v36 = vmul.f32 %v674_v46, %v480_v28  ;;  %v492_v43 = vmul.f32 %v676_v53, %v484_v38  ;;  %v478_v44 = vsel %vm470_vm4, %v462_v29, 0.0  ;;  %v391_v46 = vmul.f32 %v383_v41, %v367_v8 }
 0x110   : > { %v486_v7 = vmul.f32 %v678_v3, %v478_v44  ;;  %v482_v11 = vsel %vm474_vm5, %v466_v45, 0.0  ;;  %v437_v47 = vadd.f32 1.0, %v429_v15  ;;  %v339_v34 = vmul.f32 0.62831855, %v864_v26 }
 0x111   : > { %496 = vst [vmem:[%s940_s10 + $0x10] sm:$0xff] %v488_v36  ;;  %500 = vst [vmem:[%s940_s10 + $0x30] sm:$0xff] %v492_v43  ;;  %v490_v49 = vmul.f32 %v680_v19, %v482_v11  ;;  %v449_v50 = vmul.f32 0.5, %v441_v10  ;;  %v311_v37 = vmul.f32 %v848_v12, %v299_v42  ;;  %v399_v51 = vadd.f32 0.008333334, %v391_v46 }
 0x112   : > { %494 = vst [vmem:[%s940_s10] sm:$0xff] %v486_v7  ;;  %v445_v40 = vmul.f32 %v902_v22, %v437_v47  ;;  %v347_v52 = vadd.f32 -1.5707964, %v339_v34  ;;  %vm473_vm6 = vcmp.ge.f32.partialorder %v857_v17, 0.0  ;;  %v295_v59 = vsub.f32 %v864_v26, %v834_v6 }
 0x113   : > { %498 = vst [vmem:[%s940_s10 + $0x20] sm:$0xff] %v490_v49  ;;  %v457_v16 = vsub.f32 0.5, %v449_v50  ;;  %v407_v53 = vmul.f32 %v399_v51, %v367_v8  ;;  %v320_v56 = vmul.f32 1.442695, %v311_v37  ;;  %vm477_vm7 = vcmp.ge.f32.partialorder %v860_v21, 0.0 }
 0x114   : > { %v453_v1 = vmul.f32 0.5, %v445_v40  ;;  %v600_v54 = vclamps-f32 %v347_v52, 1.5707964  ;;  %v303_v3 = vmul.f32 %v295_v59, %v295_v59  ;;  %vm471_vm8 = vcmp.ge.f32.partialorder %v862_v25, 0.0 }
 0x115   : > { %v465_v55 = vmax.f32 %v457_v16, 0.0  ;;  %v415_v57 = vadd.f32 -0.16666667, %v407_v53  ;;  %685 = vpow2.f32 %v320_v56  ;;  %vm475_vm9 = vcmp.ge.f32.partialorder %v864_v26, 0.0 }
 0x116   : > { %v461_v58 = vsub.f32 0.5, %v453_v1  ;;  %v371_v27 = vmul.f32 %v600_v54, %v600_v54 }
 0x117   : > { %v481_v60 = vsel %vm473_vm6, %v465_v55, 0.0  ;;  %v423_v22 = vmul.f32 %v415_v57, %v367_v8  ;;  %v684_v0 = vpop.eup %683  ;;  %v315_v8 = vmul.f32 %v848_v12, %v303_v3 }
 0x118   : > { %v489_v48 = vmul.f32 %v682_v33, %v481_v60  ;;  %v469_v61 = vmax.f32 %v461_v58, 0.0  ;;  %v379_v62 = vmul.f32 2.7557319e-06, %v371_v27 }
 0x119   : > { %v431_v63 = vadd.f32 1.0, %v423_v22  ;;  %v328_v18 = vmul.f32 1.442695, %v315_v8 }
 0x11a   : > { %497 = vst [vmem:[%s940_s10 + $0x18] sm:$0xff] %v489_v48  ;;  %v485_v2 = vsel %vm477_vm7, %v469_v61, 0.0  ;;  %v387_v17 = vadd.f32 -0.0001984127, %v379_v62 }
 0x11b   : > { %v493_v35 = vmul.f32 %v684_v0, %v485_v2  ;;  %v439_v4 = vmul.f32 %v924_v32, %v431_v63  ;;  %687 = vpow2.f32 %v328_v18 }
 0x11c   : > { %v395_v6 = vmul.f32 %v387_v17, %v371_v27 }
 0x11d   : > { %501 = vst [vmem:[%s940_s10 + $0x38] sm:$0xff] %v493_v35  ;;  %v447_v5 = vmul.f32 0.5, %v439_v4 }
 0x11e   : > { %v403_v9 = vadd.f32 0.008333334, %v395_v6 }
 0x11f   : > { %v455_v13 = vsub.f32 0.5, %v447_v5  ;;  %v686_v20 = vpop.eup %685 }
 0x120   : > { %v411_v21 = vmul.f32 %v403_v9, %v371_v27 }
 0x121   : > { %v463_v14 = vmax.f32 %v455_v13, 0.0 }
 0x122   : > { %v419_v19 = vadd.f32 -0.16666667, %v411_v21 }
 0x123   : > { %v479_v23 = vsel %vm471_vm8, %v463_v14, 0.0 }
 0x124   : > { %v487_v42 = vmul.f32 %v686_v20, %v479_v23  ;;  %v427_v32 = vmul.f32 %v419_v19, %v371_v27 }
 0x125   : > { %v688_v25 = vpop.eup %687 }
 0x126   : > { %495 = vst [vmem:[%s940_s10 + $0x8] sm:$0xff] %v487_v42  ;;  %v435_v24 = vadd.f32 1.0, %v427_v32 }
 0x128   : > { %v443_v12 = vmul.f32 %v600_v54, %v435_v24 }
 0x12a   : > { %v451_v28 = vmul.f32 0.5, %v443_v12 }
 0x12c   : > { %v459_v29 = vsub.f32 0.5, %v451_v28 }
 0x12e   : > { %v467_v30 = vmax.f32 %v459_v29, 0.0 }
 0x130   : > { %v483_v31 = vsel %vm475_vm9, %v467_v30, 0.0 }
 0x131   : > { %v491_v36 = vmul.f32 %v688_v25, %v483_v31 }
 0x133   : > { %499 = vst [vmem:[%s940_s10 + $0x28] sm:$0xff] %v491_v36 }
 0x134   : > { %702 = shalt.err (!%p699_p3)
}
 0x135   : > { %s703_s29 = scalar_lea.hbm %s967_s24, 1024  ;;  %s707_s5 = scalar_lea.hbm %s1018_s3, 2048 }
 0x136   : > { %p704_p4 = scmp.ne.s32.totalorder %s967_s24, %s703_s29  ;;  %p708_p9 = scmp.lt.u32.totalorder %s967_s24, %s1018_s3 }
 0x137   : > { %p709_p10 = scmp.lt.u32.totalorder %s707_s5, %s703_s29  ;;  %p711_p12 = scmp.lt.u32.totalorder %s703_s29, %s967_s24 }
 0x138   : > { %p705_p7 = pnand %p704_p4, %p814_p5 }
 0x139   : > { %p710_p11 = por %p709_p10, %p708_p9 }
 0x13a   : > { %p706_p8 = pneg %p705_p7 }
 0x13b   : > { %p712_p13 = por %p711_p12, %p710_p11 }
 0x13d   : > { %p713_p0 = pnand %p712_p13, %p706_p8 }
 0x13f   : > { %716 = shalt.err (!%p713_p0)
}
 0x140   : > { %s754_s8 = smov 128   ;;  %s755_s9 = smov 8  }
 0x141   : > { %628 = dma.vmem_to_hbm [thread:$0]  (%p814_p5), %s969_s17, 1024, %s967_s24, %s974_s16, %s754_s8, %s754_s8, %s755_s9  }
 0x142 PF: > { %p634_p1 = scmp.ge.s32.totalorder %s751_s15, 2  ;;  %s531_s10 = sand.u32 1, %s739_s12  }
 0x143   : > { %s532_s11 = scalar_lea.sflag [#allocation3], %s531_s10 }
 0x144   : > { %p631_p2 = pnand %p634_p1, %p818_p6 }
 0x146   : > { %734 = dma.done.wait (!%p631_p2), %s532_s11, 1024  }
 0x147   : > { %736 = vsyncadd (!%p631_p2), %s532_s11, 4294966272  ;;  %p13_p3 = scmp.ge.s32.totalorder %s801_s18, 4   ;;  %s1021_s12 = smov %s743_s13 }
 0x148   : > { %s1022_s13 = smov %s747_s14  ;;  %s1023_s14 = smov %s812_s21 }
 0x149   : > { %s1024_s15 = smov %s801_s18  ;;  %15 = sbr.rel (!%p13_p3) target bundleno = 3 (0x3), region = 67 }
 0x150   :  { %537 = vsyncpa [#allocation3], 1 }
 0x151   :  { %539 = vsyncpa [#allocation3 + $0x1], 1 }

</bundles_post_ra>
